<compile_context>
chip_gen: v6e
topology: v6e:2x2x1
jax: 0.10.0
libtpu: 0.0.40
codegen_flags: <defaults>
</compile_context>

<pallas_src>
import functools

import jax
import jax.numpy as jnp
from jax.experimental import pallas as pl
from jax.experimental.pallas import tpu as pltpu


# ---------------------------------------------------------------------------
# Kernel
# ---------------------------------------------------------------------------
def combiner_kernel(z_ref, h_ref, wz_ref, bz_ref, wout_ref, bout_ref, out_ref):
    z = z_ref[...]          # (TB, z_dim)
    h_rnn = h_ref[...]      # (TB, rnn_dim)

    # hidden = tanh(z @ Wz^T + bz)   -- MXU matmul + EUP tanh
    hid = jnp.dot(z, wz_ref[...], preferred_element_type=jnp.float32)
    hid = jnp.tanh(hid + bz_ref[...])

    h_combined = 0.5 * (hid + h_rnn)            # (TB, rnn_dim)

    # One fused matmul for [loc | scale_pre]  -> (TB, 2*z_dim)
    out = jnp.dot(h_combined, wout_ref[...], preferred_element_type=jnp.float32)
    out = out + bout_ref[...]

    z_dim = out_ref.shape[-1] // 2
    # softplus (beta=1, threshold=20) applied only to the scale half, selected
    # with a lane mask instead of slice+concat (avoids cross-lane churn).
    col = jax.lax.broadcasted_iota(jnp.int32, out.shape, 1)
    sp = jnp.where(out > 20.0, out, jnp.log1p(jnp.exp(out)))
    res = jnp.where(col >= z_dim, sp, out)

    out_ref[...] = res.astype(out_ref.dtype)


# ---------------------------------------------------------------------------
# One-time parameter preparation (hoisted out of the per-step call)
# ---------------------------------------------------------------------------
def prepare_params(params):
    """Pre-transpose / concatenate weights so the hot path has no layout ops."""
    rnn_dim, z_dim = params["wz"].shape
    wz_t = jnp.asarray(params["wz"]).T                       # (z_dim, rnn_dim)
    bz = jnp.asarray(params["bz"]).reshape(1, rnn_dim)
    w_out = jnp.concatenate(                                 # (rnn_dim, 2*z_dim)
        [jnp.asarray(params["wloc"]).T, jnp.asarray(params["wscale"]).T], axis=1)
    b_out = jnp.concatenate(                                 # (1, 2*z_dim)
        [jnp.asarray(params["bloc"]), jnp.asarray(params["bscale"])]).reshape(1, 2 * z_dim)
    return {"wz_t": wz_t, "bz": bz, "w_out": w_out, "b_out": b_out}


# ---------------------------------------------------------------------------
# Wrapper
# ---------------------------------------------------------------------------
@functools.partial(jax.jit, static_argnames=("block_b",))
def combiner_forward(z_t_1, h_rnn, kparams, *, block_b=512):
    """z_t_1: (B, z_dim), h_rnn: (B, rnn_dim).

    For sequences, flatten (T, B, .) -> (T*B, .) before calling to amortize the
    pallas_call across timesteps.  Returns (loc, scale), each (B, z_dim).
    """
    B, z_dim = z_t_1.shape
    rnn_dim = h_rnn.shape[1]
    out_dim = 2 * z_dim

    tb = min(block_b, B)
    grid_b = pl.cdiv(B, tb)
    Bp = grid_b * tb
    if Bp != B:
        pad = Bp - B
        z_t_1 = jnp.pad(z_t_1, ((0, pad), (0, 0)))
        h_rnn = jnp.pad(h_rnn, ((0, pad), (0, 0)))

    out = pl.pallas_call(
        combiner_kernel,
        out_shape=jax.ShapeDtypeStruct((Bp, out_dim), z_t_1.dtype),
        grid_spec=pltpu.PrefetchScalarGridSpec(
            num_scalar_prefetch=0,
            grid=(grid_b,),
            in_specs=[
                pl.BlockSpec((tb, z_dim), lambda i: (i, 0)),        # z_t_1 tile
                pl.BlockSpec((tb, rnn_dim), lambda i: (i, 0)),      # h_rnn tile
                pl.BlockSpec((z_dim, rnn_dim), lambda i: (0, 0)),   # Wz^T (resident)
                pl.BlockSpec((1, rnn_dim), lambda i: (0, 0)),       # bz
                pl.BlockSpec((rnn_dim, out_dim), lambda i: (0, 0)),  # [Wloc^T|Wscale^T]
                pl.BlockSpec((1, out_dim), lambda i: (0, 0)),       # [bloc|bscale]
            ],
            out_specs=pl.BlockSpec((tb, out_dim), lambda i: (i, 0)),
        ),
        compiler_params=pltpu.CompilerParams(
            dimension_semantics=("parallel",)),
    )(z_t_1, h_rnn, kparams["wz_t"], kparams["bz"],
      kparams["w_out"], kparams["b_out"])

    loc = out[:B, :z_dim]
    scale = out[:B, z_dim:]
    return loc, scale


# ---------------------------------------------------------------------------
# Init + pure-JAX reference (PyTorch-equivalent)
# ---------------------------------------------------------------------------
def init_combiner_params(key, z_dim, rnn_dim, dtype=jnp.float32):
    """nn.Linear-style init: uniform(-1/sqrt(fan_in), +1/sqrt(fan_in))."""
    ks = jax.random.split(key, 6)

    def lin(kw, kb, out_f, in_f):
        bound = 1.0 / jnp.sqrt(in_f)
        w = jax.random.uniform(kw, (out_f, in_f), dtype, -bound, bound)
        b = jax.random.uniform(kb, (out_f,), dtype, -bound, bound)
        return w, b

    wz, bz = lin(ks[0], ks[1], rnn_dim, z_dim)
    wloc, bloc = lin(ks[2], ks[3], z_dim, rnn_dim)
    wscale, bscale = lin(ks[4], ks[5], z_dim, rnn_dim)
    return {"wz": wz, "bz": bz,
            "wloc": wloc, "bloc": bloc,
            "wscale": wscale, "bscale": bscale}


def combiner_reference(z_t_1, h_rnn, params):
    hid = jnp.tanh(z_t_1 @ params["wz"].T + params["bz"])
    h_combined = 0.5 * (hid + h_rnn)
    loc = h_combined @ params["wloc"].T + params["bloc"]
    s = h_combined @ params["wscale"].T + params["bscale"]
    scale = jnp.where(s > 20.0, s, jnp.log1p(jnp.exp(s)))
    return loc, scale


# ---------------------------------------------------------------------------
# Demo / correctness check
# ---------------------------------------------------------------------------
if __name__ == "__main__":
    z_dim, rnn_dim = 16, 32

    key = jax.random.PRNGKey(0)
    k_z, k_h, k_p, k_z2, k_h2 = jax.random.split(key, 5)
    params = init_combiner_params(k_p, z_dim, rnn_dim)
    kparams = prepare_params(params)   # one-time weight prep (hoisted)

    # --- small per-timestep call (matches the PyTorch module's usage) ---
    B = 8
    z_t_1 = jax.random.normal(k_z, (B, z_dim), jnp.float32)
    h_rnn = jax.random.normal(k_h, (B, rnn_dim), jnp.float32)

    loc, scale = combiner_forward(z_t_1, h_rnn, kparams)
    jax.block_until_ready((loc, scale))

    loc_ref, scale_ref = combiner_reference(z_t_1, h_rnn, params)
    assert jnp.allclose(loc, loc_ref, atol=1e-4, rtol=1e-4)
    assert jnp.allclose(scale, scale_ref, atol=1e-4, rtol=1e-4)

    # --- amortized / tiled path: flattened (B*T) batch exercising the grid ---
    BT = 1000   # deliberately not a multiple of the batch tile -> padding path
    z_big = jax.random.normal(k_z2, (BT, z_dim), jnp.float32)
    h_big = jax.random.normal(k_h2, (BT, rnn_dim), jnp.float32)

    loc_b, scale_b = combiner_forward(z_big, h_big, kparams, block_b=256)
    jax.block_until_ready((loc_b, scale_b))

    loc_bref, scale_bref = combiner_reference(z_big, h_big, params)
    assert jnp.allclose(loc_b, loc_bref, atol=1e-4, rtol=1e-4)
    assert jnp.allclose(scale_b, scale_bref, atol=1e-4, rtol=1e-4)

    print("KERNEL_OK")
</pallas_src>

<mosaic_0001>
module attributes {stable_mosaic.version = 11 : i64} {
  func.func @combiner_kernel(%arg0: i32, %arg1: memref<8x16xf32, #tpu.memory_space<vmem>>, %arg2: memref<8x32xf32, #tpu.memory_space<vmem>>, %arg3: memref<16x32xf32, #tpu.memory_space<vmem>>, %arg4: memref<1x32xf32, #tpu.memory_space<vmem>>, %arg5: memref<32x32xf32, #tpu.memory_space<vmem>>, %arg6: memref<1x32xf32, #tpu.memory_space<vmem>>, %arg7: memref<8x32xf32, #tpu.memory_space<vmem>>) attributes {dimension_semantics = [#tpu.dimension_semantics<parallel>], iteration_bounds = array<i64: 1>, scalar_prefetch = 0 : i64, scratch_operands = 0 : i64, tpu.core_type = #tpu.core_type<tc>, window_params = [{transform_indices = @transform_0, window_bounds = array<i64: 8, 16>}, {transform_indices = @transform_1, window_bounds = array<i64: 8, 32>}, {pipeline_mode = #tpu.pipeline_mode<synchronous>, transform_indices = @transform_2, window_bounds = array<i64: 16, 32>}, {pipeline_mode = #tpu.pipeline_mode<synchronous>, transform_indices = @transform_3, window_bounds = array<i64: 1, 32>}, {pipeline_mode = #tpu.pipeline_mode<synchronous>, transform_indices = @transform_4, window_bounds = array<i64: 32, 32>}, {pipeline_mode = #tpu.pipeline_mode<synchronous>, transform_indices = @transform_5, window_bounds = array<i64: 1, 32>}, {transform_indices = @transform_6, window_bounds = array<i64: 8, 32>}]} {
    %c0 = arith.constant 0 : index
    %c0_0 = arith.constant 0 : index
    %0 = vector.load %arg1[%c0, %c0_0] : memref<8x16xf32, #tpu.memory_space<vmem>>, vector<8x16xf32>
    %c0_1 = arith.constant 0 : index
    %c0_2 = arith.constant 0 : index
    %1 = vector.load %arg2[%c0_1, %c0_2] : memref<8x32xf32, #tpu.memory_space<vmem>>, vector<8x32xf32>
    %c0_3 = arith.constant 0 : index
    %c0_4 = arith.constant 0 : index
    %2 = vector.load %arg3[%c0_3, %c0_4] : memref<16x32xf32, #tpu.memory_space<vmem>>, vector<16x32xf32>
    %cst = arith.constant dense<0.000000e+00> : vector<8x32xf32>
    %3 = tpu.matmul %0, %2, %cst {dimension_numbers = #tpu.dot_dimension_numbers<[1], [0], [0], [1], [0, 0, 1, 1], [], []>} : vector<8x16xf32>, vector<16x32xf32>, vector<8x32xf32> -> vector<8x32xf32>
    %c0_5 = arith.constant 0 : index
    %c0_6 = arith.constant 0 : index
    %4 = vector.load %arg4[%c0_5, %c0_6] : memref<1x32xf32, #tpu.memory_space<vmem>>, vector<1x32xf32>
    %5 = vector.broadcast %4 : vector<1x32xf32> to vector<8x32xf32>
    %6 = arith.addf %3, %5 : vector<8x32xf32>
    %7 = math.tanh %6 : vector<8x32xf32>
    %8 = arith.addf %7, %1 : vector<8x32xf32>
    %cst_7 = arith.constant 5.000000e-01 : f32
    %9 = vector.broadcast %cst_7 : f32 to vector<8x32xf32>
    %10 = arith.mulf %9, %8 : vector<8x32xf32>
    %c0_8 = arith.constant 0 : index
    %c0_9 = arith.constant 0 : index
    %11 = vector.load %arg5[%c0_8, %c0_9] : memref<32x32xf32, #tpu.memory_space<vmem>>, vector<32x32xf32>
    %cst_10 = arith.constant dense<0.000000e+00> : vector<8x32xf32>
    %12 = tpu.matmul %10, %11, %cst_10 {dimension_numbers = #tpu.dot_dimension_numbers<[1], [0], [0], [1], [0, 0, 1, 1], [], []>} : vector<8x32xf32>, vector<32x32xf32>, vector<8x32xf32> -> vector<8x32xf32>
    %c0_11 = arith.constant 0 : index
    %c0_12 = arith.constant 0 : index
    %13 = vector.load %arg6[%c0_11, %c0_12] : memref<1x32xf32, #tpu.memory_space<vmem>>, vector<1x32xf32>
    %14 = vector.broadcast %13 : vector<1x32xf32> to vector<8x32xf32>
    %15 = arith.addf %12, %14 : vector<8x32xf32>
    %16 = tpu.iota {dimensions = array<i32: 1>} : vector<8x32xi32>
    %cst_13 = arith.constant 2.000000e+01 : f32
    %17 = vector.broadcast %cst_13 : f32 to vector<8x32xf32>
    %18 = arith.cmpf ogt, %15, %17 : vector<8x32xf32>
    %19 = math.exp %15 : vector<8x32xf32>
    %20 = math.log1p %19 : vector<8x32xf32>
    %21 = arith.select %18, %15, %20 : vector<8x32xi1>, vector<8x32xf32>
    %c16_i32 = arith.constant 16 : i32
    %22 = vector.broadcast %c16_i32 : i32 to vector<8x32xi32>
    %23 = arith.cmpi sge, %16, %22 : vector<8x32xi32>
    %24 = arith.select %23, %21, %15 : vector<8x32xi1>, vector<8x32xf32>
    %c0_14 = arith.constant 0 : index
    %c0_15 = arith.constant 0 : index
    %25 = vector.load %arg7[%c0_14, %c0_15] : memref<8x32xf32, #tpu.memory_space<vmem>>, vector<8x32xf32>
    tpu.vector_store %arg7[%c0_14, %c0_15], %24 {strides = array<i32>} : memref<8x32xf32, #tpu.memory_space<vmem>>, vector<8x32xf32>,
    return
  }
  func.func @transform_0(%arg0: i32) -> (i32, i32) {
    %c0_i32 = arith.constant 0 : i32
    %c0_i32_0 = arith.constant 0 : i32
    return %arg0, %c0_i32 : i32, i32
  }
  func.func @transform_1(%arg0: i32) -> (i32, i32) {
    %c0_i32 = arith.constant 0 : i32
    %c0_i32_0 = arith.constant 0 : i32
    return %arg0, %c0_i32 : i32, i32
  }
  func.func @transform_2(%arg0: i32) -> (i32, i32) {
    %c0_i32 = arith.constant 0 : i32
    %c0_i32_0 = arith.constant 0 : i32
    %c0_i32_1 = arith.constant 0 : i32
    return %c0_i32, %c0_i32_0 : i32, i32
  }
  func.func @transform_3(%arg0: i32) -> (i32, i32) {
    %c0_i32 = arith.constant 0 : i32
    %c0_i32_0 = arith.constant 0 : i32
    %c0_i32_1 = arith.constant 0 : i32
    return %c0_i32, %c0_i32_0 : i32, i32
  }
  func.func @transform_4(%arg0: i32) -> (i32, i32) {
    %c0_i32 = arith.constant 0 : i32
    %c0_i32_0 = arith.constant 0 : i32
    %c0_i32_1 = arith.constant 0 : i32
    return %c0_i32, %c0_i32_0 : i32, i32
  }
  func.func @transform_5(%arg0: i32) -> (i32, i32) {
    %c0_i32 = arith.constant 0 : i32
    %c0_i32_0 = arith.constant 0 : i32
    %c0_i32_1 = arith.constant 0 : i32
    return %c0_i32, %c0_i32_0 : i32, i32
  }
  func.func @transform_6(%arg0: i32) -> (i32, i32) {
    %c0_i32 = arith.constant 0 : i32
    %c0_i32_0 = arith.constant 0 : i32
    return %arg0, %c0_i32 : i32, i32
  }
}

</mosaic_0001>

<bundles_post_ra>
// kernel: combiner_forward.1
= control target key start
LH: loop header
LB: loop body
LE: loop exit
PB: predicated region body
PF: predicated region fallthrough
CT: control target
= control target key end

     0   :  { %11 = vsyncpa [#allocation3], 0  ;;  %s468_s0 = inlined_call_operand.hbm [shape: f32[8,16], index: 0, kind: input, shape index: {}]   ;;  %s469_s1 = inlined_call_operand.hbm [shape: f32[8,32], index: 1, kind: input, shape index: {}]   ;;  %s470_s2 = inlined_call_operand.hbm [shape: f32[16,32], index: 2, kind: input, shape index: {}]   ;;  %s471_s3 = inlined_call_operand.vmem [shape: f32[1,32], index: 3, kind: input, shape index: {}]   ;;  %s472_s4 = inlined_call_operand.hbm [shape: f32[32,32], index: 4, kind: input, shape index: {}]   ;;  %s473_s5 = inlined_call_operand.vmem [shape: f32[1,32], index: 5, kind: input, shape index: {}]   ;;  %s474_s6 = inlined_call_operand.vmem [shape: f32[8,32], index: 6, kind: output, shape index: {}]  }
   0x1   :  { %12 = vsyncpa [#allocation5], 0 }
   0x2   :  { %13 = vsyncpa [#allocation8], 0  ;;  %s402_s21 = smov [#allocation4]   ;;  %s403_s23 = smov [#allocation2]  }
   0x3   :  { %s30_s22 = sshll.u32 %s402_s21, 4  ;;  %s20_s24 = sshll.u32 %s403_s23, 4  ;;  %s31_s22 = int_to_ptr.vmem [resolvable:$true] %s30_s22  ;;  %s21_s24 = int_to_ptr.vmem [resolvable:$true] %s20_s24 }
   0x4   :  { %s324_s25 = scalar_lea.vmem %s31_s22, 128  ;;  %p329_p1 = scmp.lt.s32.totalorder %s31_s22, %s31_s22 }
   0x5   :  { %p325_p0 = scmp.ne.s32.totalorder %s31_s22, %s324_s25  ;;  %p330_p2 = scmp.lt.s32.totalorder %s324_s25, %s324_s25 }
   0x7   :  { %p331_p3 = por %p330_p2, %p329_p1 }
   0x9   :  { %p332_p4 = pnand %p331_p3, %p325_p0 }
   0xb   :  { %335 = shalt.err (!%p332_p4)
}
   0xc   :  { %33 = dma.hbm_to_vmem [thread:$0]  %s469_s1, 128, %s31_s22, [#allocation5]  }
   0xd   :  { %s344_s28 = scalar_lea.vmem %s21_s24, 128  ;;  %p349_p6 = scmp.lt.s32.totalorder %s21_s24, %s21_s24 }
   0xe   :  { %p345_p5 = scmp.ne.s32.totalorder %s21_s24, %s344_s28  ;;  %p350_p7 = scmp.lt.s32.totalorder %s344_s28, %s344_s28 }
  0x10   :  { %p351_p8 = por %p350_p7, %p349_p6 }
  0x12   :  { %p352_p9 = pnand %p351_p8, %p345_p5 }
  0x14   :  { %355 = shalt.err (!%p352_p9)
}
  0x15   :  { %23 = dma.hbm_to_vmem [thread:$0]  %s468_s0, 128, %s21_s24, [#allocation3]  }
  0x16   :  { %s404_s7 = smov [#allocation6]  }
  0x17   :  { %s39_s8 = sshll.u32 %s404_s7, 4  ;;  %s40_s8 = int_to_ptr.vmem [resolvable:$true] %s39_s8 }
  0x18   :  { %s364_s9 = scalar_lea.vmem %s40_s8, 256  ;;  %p369_p11 = scmp.lt.s32.totalorder %s40_s8, %s40_s8 }
  0x19   :  { %p365_p10 = scmp.ne.s32.totalorder %s40_s8, %s364_s9  ;;  %p370_p12 = scmp.lt.s32.totalorder %s364_s9, %s364_s9 }
  0x1b   :  { %p371_p13 = por %p370_p12, %p369_p11 }
  0x1d   :  { %p372_p0 = pnand %p371_p13, %p365_p10 }
  0x1f   :  { %375 = shalt.err (!%p372_p0)
}
  0x20   :  { %s405_s1 = smov 128   ;;  %s406_s10 = smov 8  }
  0x21   :  { %45 = dma.hbm_to_vmem [thread:$0]  %s470_s2, 256, %s40_s8, [#allocation5], %s405_s1, %s405_s1, %s406_s10  }
  0x22   :  { %s407_s13 = smov [#allocation7]  }
  0x23   :  { %s53_s14 = sshll.u32 %s407_s13, 4  ;;  %s54_s14 = int_to_ptr.vmem [resolvable:$true] %s53_s14 }
  0x24   :  { %s384_s0 = scalar_lea.vmem %s54_s14, 512  ;;  %p389_p2 = scmp.lt.s32.totalorder %s54_s14, %s54_s14 }
  0x25   :  { %p385_p1 = scmp.ne.s32.totalorder %s54_s14, %s384_s0  ;;  %p390_p3 = scmp.lt.s32.totalorder %s384_s0, %s384_s0 }
  0x27   :  { %p391_p4 = por %p390_p3, %p389_p2 }
  0x29   :  { %p392_p5 = pnand %p391_p4, %p385_p1 }
  0x2b   :  { %395 = shalt.err (!%p392_p5)
}
  0x2c   :  { %59 = dma.hbm_to_vmem [thread:$0]  %s472_s4, 512, %s54_s14, [#allocation8], %s405_s1, %s405_s1, %s406_s10  }
  0x2d   :  { %396 = dma.done.wait [#allocation3], 128  }
  0x2e   :  { %397 = vsyncadd [#allocation3], 4294967168 }
  0x2f   :  { %398 = dma.done.wait [#allocation5], 384  }
  0x30   :  { %399 = vsyncadd [#allocation5], 4294966912 }
  0x31   :  { %400 = dma.done.wait [#allocation8], 512  }
  0x32   :  { %401 = vsyncadd [#allocation8], 4294966784  ;;  %v408_v0 = vmov 0.0   ;;  %vm409_vm0 = vmmov 0   ;;  %v77_v1 = vld [vmem:[#allocation6 + $0x8] sm:$0xff]  ;;  %v76_v2 = vld [vmem:[#allocation6] sm:$0xff]  ;;  %v247_v24 = vlaneseq }
  0x33   :  { %284 = vmatprep.subr.mxu0 %v408_v0  ;;  %288 = vmatprep.mubr.msk.f32.mxu0 %vm409_vm0, %v408_v0  ;;  %v74_v3 = vld [vmem:[#allocation2] sm:$0xff]  ;;  %vm85_vm1 = vcmask 130048   ;;  %v165_v4 = vld [vmem:[#allocation7 + $0x18] sm:$0xff]  ;;  %v164_v5 = vld [vmem:[#allocation7 + $0x10] sm:$0xff]  ;;  %vm173_vm2 = vcmask 261120  }
  0x34   :  { %291 = vmatprep.subr.mxu1 %v408_v0  ;;  %299 = vmatprep.mubr.msk.f32.mxu1 %vm409_vm0, %v408_v0  ;;  %v163_v6 = vld [vmem:[#allocation7 + $0x8] sm:$0xff]  ;;  %v162_v7 = vld [vmem:[#allocation7] sm:$0xff]  ;;  %v248_v26 = vand.u32 127, %v247_v24 }
  0x35   :  { %285 = vmatpush3.msra.mxu0 %v77_v1  ;;  %292 = vmatpush3.msra.mxu1 %v165_v4  ;;  %v272_v8 = vld [vmem:[%s471_s3] ss:$0 sm:$0xff]  ;;  %v75_v12 = vld [vmem:[#allocation4] sm:$0xff] }
  0x36   :  { %286 = vmatprep.subr.mxu0 %v408_v0  ;;  %293 = vmatprep.subr.mxu1 %v408_v0  ;;  %v274_v16 = vld [vmem:[%s473_s5] ss:$0 sm:$0xff]  ;;  %vm262_vm4 = vcmp.ge.s32.totalorder %v248_v26, 16 }
  0x37   :  { %287 = vmatpush3.msra.mxu0 %v76_v2  ;;  %294 = vmatpush3.msra.mxu1 %v164_v5 }
  0x38   :  { %289 = vmatmul.mubr.msk.f32.vlgmr.msra.gmra.mxu0 %vm85_vm1, %v74_v3  ;;  %295 = vmatprep.subr.mxu1 %v408_v0 }
  0x39   :  { %296 = vmatpush3.msra.mxu1 %v163_v6 }
  0x3a   :  { %297 = vmatprep.subr.mxu1 %v408_v0 }
  0x3b   :  { %298 = vmatpush3.msra.mxu1 %v162_v7 }
  0xf8   :  { %v155_v9 = vpop.f32.mrf.mxu0 }
  0xf9   :  { %v156_v10 = vadd.f32 %v272_v8, %v155_v9 }
  0xfa   :  { %v290_v11 = vpop.f32.mrf.mxu0 }
  0xfb   :  { %310 = vtanh.f32 %v156_v10 }
 0x108   :  { %v311_v13 = vpop.eup %310 }
 0x109   :  { %v160_v14 = vadd.f32 %v311_v13, %v75_v12 }
 0x10b   :  { %v161_v15 = vmul.f32 0.5, %v160_v14 }
 0x10d   :  { %300 = vmatmul.mubr.msk.f32.vlgmr.msra.gmra.mxu1 %vm173_vm2, %v161_v15 }
 0x1cd   :  { %v243_v17 = vpop.f32.mrf.mxu1 }
 0x1ce   :  { %v244_v18 = vadd.f32 %v274_v16, %v243_v17 }
 0x1cf   :  { %v301_v19 = vpop.f32.mrf.mxu1 }
 0x1d0   :  { %v250_v20 = vmul.f32 1.442695, %v244_v18  ;;  %vm249_vm5 = vcmp.gt.f32.partialorder %v244_v18, 20.0 }
 0x1d2   :  { %312 = vpow2.f32 %v250_v20 }
 0x1df   :  { %v313_v21 = vpop.eup %312 }
 0x1e0   :  { %v252_v22 = vadd.f32 1.0, %v313_v21  ;;  %v255_v23 = vmul.f32 -0.5, %v313_v21  ;;  %v258_v27 = vand.u32 2147483647, %v313_v21 }
 0x1e2   :  { %314 = vlog2.f32 %v252_v22  ;;  %v256_v25 = vadd.f32 1.0, %v255_v23  ;;  %vm259_vm3 = vcmp.lt.f32.partialorder %v258_v27, 0.0004427343 }
 0x1e4   :  { %v257_v30 = vmul.f32 %v313_v21, %v256_v25 }
 0x1ef   :  { %v315_v28 = vpop.eup %314 }
 0x1f0   :  { %v254_v29 = vmul.f32 0.6931472, %v315_v28 }
 0x1f2   :  { %v260_v31 = vsel %vm259_vm3, %v257_v30, %v254_v29 }
 0x1f3   :  { %v261_v32 = vsel %vm249_vm5, %v244_v18, %v260_v31 }
 0x1f4   :  { %v263_v33 = vsel %vm262_vm4, %v261_v32, %v244_v18 }
 0x1f5   :  { %264 = vst.msk [vmem:[%s474_s6] sm:$0xff] %vm173_vm2, %v263_v33 }
 0x1f6   :  { %269 = vsyncpa [#allocation3], 1 }
 0x1f7   :  { %270 = vsyncpa [#allocation5], 1 }
 0x1f8   :  { %271 = vsyncpa [#allocation8], 1 }

</bundles_post_ra>
